<compile_context>
chip_gen: v7x
topology: tpu7x:2x2x1
jax: 0.10.0
libtpu: 0.0.40
codegen_flags: <defaults>
</compile_context>

<pallas_src>
import jax
import jax.numpy as jnp
from jax.experimental import pallas as pl
from jax.experimental.pallas import tpu as pltpu


def _fused_hetero_gcn_kernel(x_ref, a1_ref, a2_ref, w_ref, b_ref, o_ref):
    """All num_layers of HeteroConv(sum of 2 GCNConvs) + Identity + ReLU."""
    num_layers = w_ref.shape[0]
    c_pad = x_ref.shape[1]

    a1 = a1_ref[...]                      # (n_pad, n_pad)  bf16, resident once
    a2 = a2_ref[...]
    h = x_ref[...]                        # (n_pad, c_pad)  bf16

    act = None
    for l in range(num_layers):           # static unroll over layers
        # Fused feature transform for both edge types: X @ [W1 | W2]
        xw = jnp.dot(h, w_ref[l], preferred_element_type=jnp.float32)
        xw = xw.astype(h.dtype)           # back to bf16 for the aggregation MXU pass
        # Dense-adjacency aggregation per edge type, HeteroConv(aggr='sum')
        agg = jnp.dot(a1, xw[:, :c_pad], preferred_element_type=jnp.float32)
        agg = agg + jnp.dot(a2, xw[:, c_pad:], preferred_element_type=jnp.float32)
        # folded bias (b1 + b2) -> Identity norm (norm=None) -> ReLU
        act = jnp.maximum(agg + b_ref[l], 0.0)          # f32
        h = act.astype(h.dtype)                          # carry bf16 to next layer

    o_ref[...] = act.astype(o_ref.dtype)  # lane-dense (n_pad, c_pad) f32 store


def _round_up(v, m):
    return ((v + m - 1) // m) * m


def _pack_inputs(x, adjs, params, compute_dtype):
    """Pad to (8,128)-friendly shapes, fuse edge-type weights, fold biases."""
    a1, a2 = adjs
    n, c_in = x.shape
    c_hid = params[0][0][0].shape[1]

    c_pad = _round_up(max(c_in, c_hid, 128), 128)   # lane-dense channel width
    n_pad = _round_up(n, 8)                         # sublane alignment

    def pad2d(arr, rows, cols):
        r, c = arr.shape
        return jnp.pad(arr, ((0, rows - r), (0, cols - c)))

    w_layers, b_layers = [], []
    for (w1, b1), (w2, b2) in params:
        w_cat = jnp.concatenate(
            [pad2d(w1, c_pad, c_pad), pad2d(w2, c_pad, c_pad)], axis=1)
        w_layers.append(w_cat)                       # (c_pad, 2*c_pad)
        b_layers.append(pad2d(b1 + b2, 1, c_pad))    # folded bias (1, c_pad)

    w_stack = jnp.stack(w_layers).astype(compute_dtype)   # (L, c_pad, 2*c_pad)
    b_stack = jnp.stack(b_layers).astype(jnp.float32)     # (L, 1, c_pad)

    x_p = pad2d(x, n_pad, c_pad).astype(compute_dtype)
    a1_p = pad2d(a1, n_pad, n_pad).astype(compute_dtype)  # small int counts: exact in bf16
    a2_p = pad2d(a2, n_pad, n_pad).astype(compute_dtype)
    return x_p, a1_p, a2_p, w_stack, b_stack, n, n_pad, c_pad, c_hid


def hetero_gnn_pool_forward(x, adjs, params, *, compute_dtype=jnp.bfloat16):
    assert len(params) >= 1
    x_p, a1_p, a2_p, w_stack, b_stack, n, n_pad, c_pad, c_hid = _pack_inputs(
        x, adjs, params, compute_dtype)

    vmem = pl.BlockSpec(memory_space=pltpu.MemorySpace.VMEM)  # full array resident
    out = pl.pallas_call(
        _fused_hetero_gcn_kernel,
        out_shape=jax.ShapeDtypeStruct((n_pad, c_pad), jnp.float32),
        in_specs=[vmem] * 5,
        out_specs=vmem,
    )(x_p, a1_p, a2_p, w_stack, b_stack)
    return out[:n, :c_hid]


def _reference_forward(x, adjs, params, *, compute_dtype=jnp.bfloat16):
    """Pure-JAX forward with identical packing/precision (for the sanity check)."""
    x_p, a1_p, a2_p, w_stack, b_stack, n, n_pad, c_pad, c_hid = _pack_inputs(
        x, adjs, params, compute_dtype)
    h = x_p
    act = None
    for l in range(w_stack.shape[0]):
        xw = jnp.dot(h, w_stack[l], preferred_element_type=jnp.float32).astype(h.dtype)
        agg = (jnp.dot(a1_p, xw[:, :c_pad], preferred_element_type=jnp.float32)
               + jnp.dot(a2_p, xw[:, c_pad:], preferred_element_type=jnp.float32))
        act = jnp.maximum(agg + b_stack[l], 0.0)
        h = act.astype(h.dtype)
    return act[:n, :c_hid]


def init_params(key, in_channels, hidden_channels, num_layers, num_edge_types=2):
    """Glorot-uniform weights, small random biases for every GCNConv."""
    params = []
    for layer in range(num_layers):
        c_in = in_channels if layer == 0 else hidden_channels
        layer_params = []
        for _ in range(num_edge_types):
            key, kw, kb = jax.random.split(key, 3)
            scale = jnp.sqrt(6.0 / (c_in + hidden_channels))
            w = jax.random.uniform(kw, (c_in, hidden_channels), jnp.float32,
                                   -scale, scale)
            b = 0.1 * jax.random.normal(kb, (1, hidden_channels), jnp.float32)
            layer_params.append((w, b))
        params.append(layer_params)
    return params


if __name__ == "__main__":
    key = jax.random.PRNGKey(0)

    N = 64                 # number of 'gene' nodes in the batch
    in_channels = 16
    hidden_channels = 32
    num_layers = 2
    num_edges = 256        # per edge type

    key, kx, ke1, ke2, kp = jax.random.split(key, 5)
    x = jax.random.normal(kx, (N, in_channels), jnp.float32)

    def make_dense_adj(k):
        src = jax.random.randint(k, (num_edges,), 0, N)
        dst = jax.random.randint(jax.random.fold_in(k, 1), (num_edges,), 0, N)
        # A[dst, src] = #messages src -> dst.  GCNConv(normalize=False) adds no
        # self-loops and no degree normalization, so use the raw counts.
        return jnp.zeros((N, N), jnp.float32).at[dst, src].add(1.0)

    a1 = make_dense_adj(ke1)   # ('gene','physical_interaction','gene')
    a2 = make_dense_adj(ke2)   # ('gene','regulatory_interaction','gene')

    params = init_params(kp, in_channels, hidden_channels, num_layers)

    out = jax.block_until_ready(hetero_gnn_pool_forward(x, (a1, a2), params))
    assert out.shape == (N, hidden_channels), out.shape

    ref = _reference_forward(x, (a1, a2), params)
    assert jnp.allclose(out, ref, atol=1e-2, rtol=1e-2), \
        float(jnp.max(jnp.abs(out - ref)))

    print("KERNEL_OK")
</pallas_src>

<mosaic_0001>
module attributes {stable_mosaic.version = 11 : i64} {
  func.func @_fused_hetero_gcn_kernel(%arg0: memref<64x128xbf16, #tpu.memory_space<vmem>>, %arg1: memref<64x64xbf16, #tpu.memory_space<vmem>>, %arg2: memref<64x64xbf16, #tpu.memory_space<vmem>>, %arg3: memref<2x128x256xbf16, #tpu.memory_space<vmem>>, %arg4: memref<2x1x128xf32, #tpu.memory_space<vmem>>, %arg5: memref<64x128xf32, #tpu.memory_space<vmem>>) attributes {dimension_semantics = [], scalar_prefetch = 0 : i64, scratch_operands = 0 : i64, tpu.core_type = #tpu.core_type<tc>} {
    %c0 = arith.constant 0 : index
    %c0_0 = arith.constant 0 : index
    %0 = vector.load %arg1[%c0, %c0_0] : memref<64x64xbf16, #tpu.memory_space<vmem>>, vector<64x64xbf16>
    %c0_1 = arith.constant 0 : index
    %c0_2 = arith.constant 0 : index
    %1 = vector.load %arg2[%c0_1, %c0_2] : memref<64x64xbf16, #tpu.memory_space<vmem>>, vector<64x64xbf16>
    %c0_3 = arith.constant 0 : index
    %c0_4 = arith.constant 0 : index
    %2 = vector.load %arg0[%c0_3, %c0_4] : memref<64x128xbf16, #tpu.memory_space<vmem>>, vector<64x128xbf16>
    %c0_5 = arith.constant 0 : index
    %c0_6 = arith.constant 0 : index
    %c0_7 = arith.constant 0 : index
    %3 = vector.load %arg3[%c0_5, %c0_6, %c0_7] : memref<2x128x256xbf16, #tpu.memory_space<vmem>>, vector<1x128x256xbf16>
    %4 = vector.shape_cast %3 : vector<1x128x256xbf16> to vector<128x256xbf16>
    %cst = arith.constant dense<0.000000e+00> : vector<64x256xf32>
    %5 = tpu.matmul %2, %4, %cst {dimension_numbers = #tpu.dot_dimension_numbers<[1], [0], [0], [1], [0, 0, 1, 1], [], []>} : vector<64x128xbf16>, vector<128x256xbf16>, vector<64x256xf32> -> vector<64x256xf32>
    %6 = arith.truncf %5 : vector<64x256xf32> to vector<64x256xbf16>
    %7 = vector.extract_strided_slice %6 {offsets = [0, 0], sizes = [64, 128], strides = [1, 1]} : vector<64x256xbf16> to vector<64x128xbf16>
    %cst_8 = arith.constant dense<0.000000e+00> : vector<64x128xf32>
    %8 = tpu.matmul %0, %7, %cst_8 {dimension_numbers = #tpu.dot_dimension_numbers<[1], [0], [0], [1], [0, 0, 1, 1], [], []>} : vector<64x64xbf16>, vector<64x128xbf16>, vector<64x128xf32> -> vector<64x128xf32>
    %9 = vector.extract_strided_slice %6 {offsets = [0, 128], sizes = [64, 128], strides = [1, 1]} : vector<64x256xbf16> to vector<64x128xbf16>
    %cst_9 = arith.constant dense<0.000000e+00> : vector<64x128xf32>
    %10 = tpu.matmul %1, %9, %cst_9 {dimension_numbers = #tpu.dot_dimension_numbers<[1], [0], [0], [1], [0, 0, 1, 1], [], []>} : vector<64x64xbf16>, vector<64x128xbf16>, vector<64x128xf32> -> vector<64x128xf32>
    %11 = arith.addf %8, %10 : vector<64x128xf32>
    %c0_10 = arith.constant 0 : index
    %c0_11 = arith.constant 0 : index
    %c0_12 = arith.constant 0 : index
    %12 = vector.load %arg4[%c0_10, %c0_11, %c0_12] : memref<2x1x128xf32, #tpu.memory_space<vmem>>, vector<1x1x128xf32>
    %13 = vector.shape_cast %12 : vector<1x1x128xf32> to vector<1x128xf32>
    %14 = vector.broadcast %13 : vector<1x128xf32> to vector<64x128xf32>
    %15 = arith.addf %11, %14 : vector<64x128xf32>
    %cst_13 = arith.constant 0.000000e+00 : f32
    %16 = vector.broadcast %cst_13 : f32 to vector<64x128xf32>
    %17 = arith.maximumf %15, %16 : vector<64x128xf32>
    %18 = arith.truncf %17 : vector<64x128xf32> to vector<64x128xbf16>
    %c1 = arith.constant 1 : index
    %c0_14 = arith.constant 0 : index
    %c0_15 = arith.constant 0 : index
    %19 = vector.load %arg3[%c1, %c0_14, %c0_15] : memref<2x128x256xbf16, #tpu.memory_space<vmem>>, vector<1x128x256xbf16>
    %20 = vector.shape_cast %19 : vector<1x128x256xbf16> to vector<128x256xbf16>
    %cst_16 = arith.constant dense<0.000000e+00> : vector<64x256xf32>
    %21 = tpu.matmul %18, %20, %cst_16 {dimension_numbers = #tpu.dot_dimension_numbers<[1], [0], [0], [1], [0, 0, 1, 1], [], []>} : vector<64x128xbf16>, vector<128x256xbf16>, vector<64x256xf32> -> vector<64x256xf32>
    %22 = arith.truncf %21 : vector<64x256xf32> to vector<64x256xbf16>
    %23 = vector.extract_strided_slice %22 {offsets = [0, 0], sizes = [64, 128], strides = [1, 1]} : vector<64x256xbf16> to vector<64x128xbf16>
    %cst_17 = arith.constant dense<0.000000e+00> : vector<64x128xf32>
    %24 = tpu.matmul %0, %23, %cst_17 {dimension_numbers = #tpu.dot_dimension_numbers<[1], [0], [0], [1], [0, 0, 1, 1], [], []>} : vector<64x64xbf16>, vector<64x128xbf16>, vector<64x128xf32> -> vector<64x128xf32>
    %25 = vector.extract_strided_slice %22 {offsets = [0, 128], sizes = [64, 128], strides = [1, 1]} : vector<64x256xbf16> to vector<64x128xbf16>
    %cst_18 = arith.constant dense<0.000000e+00> : vector<64x128xf32>
    %26 = tpu.matmul %1, %25, %cst_18 {dimension_numbers = #tpu.dot_dimension_numbers<[1], [0], [0], [1], [0, 0, 1, 1], [], []>} : vector<64x64xbf16>, vector<64x128xbf16>, vector<64x128xf32> -> vector<64x128xf32>
    %27 = arith.addf %24, %26 : vector<64x128xf32>
    %c1_19 = arith.constant 1 : index
    %c0_20 = arith.constant 0 : index
    %c0_21 = arith.constant 0 : index
    %28 = vector.load %arg4[%c1_19, %c0_20, %c0_21] : memref<2x1x128xf32, #tpu.memory_space<vmem>>, vector<1x1x128xf32>
    %29 = vector.shape_cast %28 : vector<1x1x128xf32> to vector<1x128xf32>
    %30 = vector.broadcast %29 : vector<1x128xf32> to vector<64x128xf32>
    %31 = arith.addf %27, %30 : vector<64x128xf32>
    %cst_22 = arith.constant 0.000000e+00 : f32
    %32 = vector.broadcast %cst_22 : f32 to vector<64x128xf32>
    %33 = arith.maximumf %31, %32 : vector<64x128xf32>
    %c0_23 = arith.constant 0 : index
    %c0_24 = arith.constant 0 : index
    %34 = vector.load %arg5[%c0_23, %c0_24] : memref<64x128xf32, #tpu.memory_space<vmem>>, vector<64x128xf32>
    tpu.vector_store %arg5[%c0_23, %c0_24], %33 {strides = array<i32>} : memref<64x128xf32, #tpu.memory_space<vmem>>, vector<64x128xf32>,
    return
  }
}

</mosaic_0001>

<bundles_post_ra>
// kernel: tpu_custom_call.1
= control target key start
LH: loop header
LB: loop body
LE: loop exit
PB: predicated region body
PF: predicated region fallthrough
CT: control target
= control target key end

     0   :  { %10 = vsyncpa [#allocation3], 0  ;;  %s1437_s0 = inlined_call_operand.hbm [shape: bf16[64,128], index: 0, kind: input, shape index: {}]   ;;  %s1438_s1 = inlined_call_operand.hbm [shape: bf16[64,64], index: 1, kind: input, shape index: {}]   ;;  %s1439_s2 = inlined_call_operand.hbm [shape: bf16[64,64], index: 2, kind: input, shape index: {}]   ;;  %s1440_s3 = inlined_call_operand.hbm [shape: bf16[2,128,256], index: 3, kind: input, shape index: {}]   ;;  %s1441_s4 = inlined_call_operand.vmem [shape: f32[2,1,128], index: 4, kind: input, shape index: {}]   ;;  %s1442_s5 = inlined_call_operand.hbm [shape: f32[64,128], index: 5, kind: output, shape index: {}]  }
   0x1   :  { %11 = vsyncpa [#allocation6], 0 }
   0x2   :  { %12 = vsyncpa [#allocation9], 0 }
   0x3   :  { %13 = vsyncpa [#allocation4], 0  ;;  %s1246_s18 = smov [#allocation5]   ;;  %s1247_s20 = smov [#allocation2]  }
   0x4   :  { %s31_s19 = sshll.u32 %s1246_s18, 4  ;;  %s19_s21 = sshll.u32 %s1247_s20, 4  ;;  %s32_s19 = int_to_ptr.vmem [resolvable:$true] %s31_s19  ;;  %s1286_s21 = int_to_ptr.vmem [resolvable:$true] %s19_s21 }
   0x5   :  { %s1128_s24 = scalar_lea.hbm %s1438_s1, 512 }
   0x6   :  { %p1129_p0 = scmp.ne.s32.totalorder %s1438_s1, %s1128_s24  ;;  %p1132_p1 = scmp.lt.u32.totalorder %s1128_s24, %s1438_s1 }
   0x8   :  { %p1134_p2 = pnand %p1132_p1, %p1129_p0 }
   0xa   :  { %1137 = shalt.err (!%p1134_p2)
}
   0xb   :  { %s1138_s29 = scalar_lea.vmem %s32_s19, 512  ;;  %p1143_p4 = scmp.lt.s32.totalorder %s32_s19, %s32_s19 }
   0xc   :  { %p1139_p3 = scmp.ne.s32.totalorder %s32_s19, %s1138_s29  ;;  %p1144_p5 = scmp.lt.s32.totalorder %s1138_s29, %s1138_s29 }
   0xe   :  { %p1145_p6 = por %p1144_p5, %p1143_p4 }
  0x10   :  { %p1146_p7 = pnand %p1145_p6, %p1139_p3 }
  0x12   :  { %1149 = shalt.err (!%p1146_p7)
}
  0x13   :  { %s1248_s30 = smov 64   ;;  %s1249_s6 = smov 4  }
  0x14   :  { %37 = dma.hbm_to_vmem [thread:$0]  %s1438_s1, 512, %s32_s19, [#allocation6], %s1248_s30, %s1248_s30, %s1249_s6  }
  0x15   :  { %s1150_s11 = scalar_lea.hbm %s1437_s0, 512 }
  0x16   :  { %p1151_p8 = scmp.ne.s32.totalorder %s1437_s0, %s1150_s11  ;;  %p1154_p9 = scmp.lt.u32.totalorder %s1150_s11, %s1437_s0 }
  0x18   :  { %p1156_p10 = pnand %p1154_p9, %p1151_p8 }
  0x1a   :  { %1159 = shalt.err (!%p1156_p10)
}
  0x1b   :  { %s1160_s16 = scalar_lea.vmem %s1286_s21, 512  ;;  %p1165_p12 = scmp.lt.s32.totalorder %s1286_s21, %s1286_s21 }
  0x1c   :  { %p1161_p11 = scmp.ne.s32.totalorder %s1286_s21, %s1160_s16  ;;  %p1166_p13 = scmp.lt.s32.totalorder %s1160_s16, %s1160_s16 }
  0x1e   :  { %p1167_p0 = por %p1166_p13, %p1165_p12 }
  0x20   :  { %p1168_p1 = pnand %p1167_p0, %p1161_p11 }
  0x22   :  { %1171 = shalt.err (!%p1168_p1)
}
  0x23   :  { %25 = dma.hbm_to_vmem [thread:$0]  %s1437_s0, 512, %s1286_s21, [#allocation3], %s1248_s30, %s1248_s30, %s1249_s6  }
  0x24   :  { %s1250_s18 = smov [#allocation7]   ;;  %s1251_s20 = smov [#allocation8]  }
  0x25   :  { %s43_s19 = sshll.u32 %s1250_s18, 4  ;;  %s55_s22 = sshll.u32 %s1251_s20, 4  ;;  %s44_s19 = int_to_ptr.vmem [resolvable:$true] %s43_s19  ;;  %s1323_s22 = int_to_ptr.vmem [resolvable:$true] %s55_s22 }
  0x26   :  { %s1172_s25 = scalar_lea.hbm %s1439_s2, 512 }
  0x27   :  { %p1173_p2 = scmp.ne.s32.totalorder %s1439_s2, %s1172_s25  ;;  %p1176_p3 = scmp.lt.u32.totalorder %s1172_s25, %s1439_s2 }
  0x29   :  { %p1178_p4 = pnand %p1176_p3, %p1173_p2 }
  0x2b   :  { %1181 = shalt.err (!%p1178_p4)
}
  0x2c   :  { %s1182_s0 = scalar_lea.vmem %s44_s19, 512  ;;  %p1187_p6 = scmp.lt.s32.totalorder %s44_s19, %s44_s19 }
  0x2d   :  { %p1183_p5 = scmp.ne.s32.totalorder %s44_s19, %s1182_s0  ;;  %p1188_p7 = scmp.lt.s32.totalorder %s1182_s0, %s1182_s0 }
  0x2f   :  { %p1189_p8 = por %p1188_p7, %p1187_p6 }
  0x31   :  { %p1190_p9 = pnand %p1189_p8, %p1183_p5 }
  0x33   :  { %1193 = shalt.err (!%p1190_p9)
}
  0x34   :  { %49 = dma.hbm_to_vmem [thread:$0]  %s1439_s2, 512, %s44_s19, [#allocation6], %s1248_s30, %s1248_s30, %s1249_s6  }
  0x35   :  { %s1194_s10 = scalar_lea.hbm %s1440_s3, 4096 }
  0x36   :  { %p1195_p10 = scmp.ne.s32.totalorder %s1440_s3, %s1194_s10  ;;  %p1198_p11 = scmp.lt.u32.totalorder %s1194_s10, %s1440_s3 }
  0x38   :  { %p1200_p12 = pnand %p1198_p11, %p1195_p10 }
  0x3a   :  { %1203 = shalt.err (!%p1200_p12)
}
  0x3b   :  { %s1204_s15 = scalar_lea.vmem %s1323_s22, 4096  ;;  %p1209_p0 = scmp.lt.s32.totalorder %s1323_s22, %s1323_s22 }
  0x3c   :  { %p1205_p13 = scmp.ne.s32.totalorder %s1323_s22, %s1204_s15  ;;  %p1210_p1 = scmp.lt.s32.totalorder %s1204_s15, %s1204_s15 }
  0x3e   :  { %p1211_p2 = por %p1210_p1, %p1209_p0 }
  0x40   :  { %p1212_p3 = pnand %p1211_p2, %p1205_p13 }
  0x42   :  { %1215 = shalt.err (!%p1212_p3)
}
  0x43   :  { %s1252_s2 = smov 128   ;;  %s1253_s30 = smov 8  }
  0x44   :  { %61 = dma.hbm_to_vmem [thread:$0]  %s1440_s3, 4096, %s1323_s22, [#allocation9], %s1252_s2, %s1252_s2, %s1253_s30  }
  0x45   :  { %1238 = dma.done.wait [#allocation3], 512  }
  0x46   :  { %1239 = vsyncadd [#allocation3], 4294966784 }
  0x47   :  { %1240 = dma.done.wait [#allocation6], 1024  }
  0x48   :  { %1241 = vsyncadd [#allocation6], 4294966272 }
  0x49   :  { %1242 = dma.done.wait [#allocation9], 4096  }
  0x4a   :  { %1243 = vsyncadd [#allocation9], 4294963200  ;;  %v1254_v0 = vmov 0   ;;  %v1068_v1 = vld [vmem:[#allocation8 + $0x4] ss:$8 sps:$4 sm:$0xff]   ;;  %v1094_v19 = vld [vmem:[#allocation2 + $0x10] sm:$0xff]  }
  0x4b   :  { %253 = vmatprep.mubr.bf16.mxu0 %v1254_v0  ;;  %v1070_v2 = vld [vmem:[#allocation8] ss:$8 sps:$4 sm:$0xff]   ;;  %221 = vmatprep.subr.bf16.mxu0 %v1068_v1  ;;  %v1071_v3 = vld [vmem:[#allocation8 + $0x14] ss:$8 sps:$4 sm:$0xff]   ;;  %v1073_v4 = vld [vmem:[#allocation8 + $0x10] ss:$8 sps:$4 sm:$0xff]  }
  0x4c   :  { %222 = vmatpush1.bf16.msra.mxu0 %v1070_v2  ;;  %v1074_v5 = vld [vmem:[#allocation8 + $0x24] ss:$8 sps:$4 sm:$0xff]   ;;  %v1076_v6 = vld [vmem:[#allocation8 + $0x20] ss:$8 sps:$4 sm:$0xff]   ;;  %v1077_v7 = vld [vmem:[#allocation8 + $0x34] ss:$8 sps:$4 sm:$0xff]  }
  0x4d   :  { %223 = vmatprep.subr.bf16.mxu0 %v1071_v3  ;;  %v1079_v8 = vld [vmem:[#allocation8 + $0x30] ss:$8 sps:$4 sm:$0xff]   ;;  %v1080_v9 = vld [vmem:[#allocation8 + $0x44] ss:$8 sps:$4 sm:$0xff]   ;;  %v1082_v10 = vld [vmem:[#allocation8 + $0x40] ss:$8 sps:$4 sm:$0xff]  }
  0x4e   :  { %v1083_v11 = vld [vmem:[#allocation8 + $0x54] ss:$8 sps:$4 sm:$0xff]   ;;  %v1085_v12 = vld [vmem:[#allocation8 + $0x50] ss:$8 sps:$4 sm:$0xff]   ;;  %v1086_v13 = vld [vmem:[#allocation8 + $0x64] ss:$8 sps:$4 sm:$0xff]  }
  0x4f   :  { %v1088_v14 = vld [vmem:[#allocation8 + $0x60] ss:$8 sps:$4 sm:$0xff]   ;;  %v1089_v15 = vld [vmem:[#allocation8 + $0x74] ss:$8 sps:$4 sm:$0xff]   ;;  %v1091_v16 = vld [vmem:[#allocation8 + $0x70] ss:$8 sps:$4 sm:$0xff]  }
  0x50   :  { %224 = vmatpush1.bf16.msra.mxu0 %v1073_v4  ;;  %v1092_v17 = vld [vmem:[#allocation2] sm:$0xff]   ;;  %v1093_v18 = vld [vmem:[#allocation2 + $0x8] sm:$0xff]   ;;  %v1095_v20 = vld [vmem:[#allocation2 + $0x18] sm:$0xff]   ;;  %vm322_vm0 = vcmask 523264  }
  0x51   :  { %225 = vmatprep.subr.bf16.mxu0 %v1074_v5  ;;  %v1365_v21 = vld [vmem:[#allocation7] sm:$0xff]   ;;  %v1109_v24 = vld [vmem:[#allocation8 + $0x94] ss:$8 sps:$4 sm:$0xff]   ;;  %v1107_v25 = vld [vmem:[#allocation8 + $0x90] ss:$8 sps:$4 sm:$0xff]  }
  0x52   :  { %986 = vmatprep.mubr.msk.bf16.mxu1 %vm322_vm0, %v1365_v21  ;;  %v1104_v22 = vld [vmem:[#allocation8 + $0x80] ss:$8 sps:$4 sm:$0xff]   ;;  %v1106_v23 = vld [vmem:[#allocation8 + $0x84] ss:$8 sps:$4 sm:$0xff]   ;;  %v1115_v28 = vld [vmem:[#allocation8 + $0xb4] ss:$8 sps:$4 sm:$0xff]  }
  0x53   :  { %v1112_v26 = vld [vmem:[#allocation8 + $0xa4] ss:$8 sps:$4 sm:$0xff]   ;;  %v1110_v27 = vld [vmem:[#allocation8 + $0xa0] ss:$8 sps:$4 sm:$0xff]   ;;  %v1113_v29 = vld [vmem:[#allocation8 + $0xb0] ss:$8 sps:$4 sm:$0xff]  }
  0x54   :  { %226 = vmatpush1.bf16.msra.mxu0 %v1076_v6  ;;  %v1118_v30 = vld [vmem:[#allocation8 + $0xc4] ss:$8 sps:$4 sm:$0xff]   ;;  %v1116_v31 = vld [vmem:[#allocation8 + $0xc0] ss:$8 sps:$4 sm:$0xff]   ;;  %v1121_v32 = vld [vmem:[#allocation8 + $0xd4] ss:$8 sps:$4 sm:$0xff]  }
  0x55   :  { %227 = vmatprep.subr.bf16.mxu0 %v1077_v7  ;;  %v1119_v33 = vld [vmem:[#allocation8 + $0xd0] ss:$8 sps:$4 sm:$0xff]   ;;  %v1369_v58 = vld [vmem:[#allocation7 + $0x8] sm:$0xff]   ;;  %v1379_v61 = vld [vmem:[#allocation5] sm:$0xff]  }
  0x56   :  { %v1371_v59 = vld [vmem:[#allocation7 + $0x10] sm:$0xff]   ;;  %v1377_v60 = vld [vmem:[#allocation7 + $0x18] sm:$0xff]   ;;  %v1385_v62 = vld [vmem:[#allocation5 + $0x8] sm:$0xff]  }
  0x57   :  { %v1387_v63 = vld [vmem:[#allocation5 + $0x10] sm:$0xff]   ;;  %v1393_v1 = vld [vmem:[#allocation5 + $0x18] sm:$0xff]   ;;  %v1124_v2 = vld [vmem:[#allocation8 + $0xe4] ss:$8 sps:$4 sm:$0xff]  }
  0x58   :  { %228 = vmatpush1.bf16.msra.mxu0 %v1079_v8  ;;  %v1122_v3 = vld [vmem:[#allocation8 + $0xe0] ss:$8 sps:$4 sm:$0xff]   ;;  %v1127_v4 = vld [vmem:[#allocation8 + $0xf4] ss:$8 sps:$4 sm:$0xff]   ;;  %v1125_v5 = vld [vmem:[#allocation8 + $0xf0] ss:$8 sps:$4 sm:$0xff]  }
  0x59   :  { %229 = vmatprep.subr.bf16.mxu0 %v1080_v9  ;;  %v919_v6 = vld [vmem:[%s1441_s4] ss:$0 sm:$0xff] }
  0x5c   :  { %230 = vmatpush1.bf16.msra.mxu0 %v1082_v10 }
  0x5d   :  { %231 = vmatprep.subr.bf16.mxu0 %v1083_v11 }
  0x60   :  { %232 = vmatpush1.bf16.msra.mxu0 %v1085_v12 }
  0x61   :  { %233 = vmatprep.subr.bf16.mxu0 %v1086_v13 }
  0x64   :  { %234 = vmatpush1.bf16.msra.mxu0 %v1088_v14 }
  0x65   :  { %235 = vmatprep.subr.bf16.mxu0 %v1089_v15 }
  0x68   :  { %236 = vmatpush1.bf16.msra.mxu0 %v1091_v16 }
  0x69   :  { %621 = vmatprep.subr.bf16.mxu0 %v1106_v23 }
  0x6b   :  { %254 = vmatmul.mubr.bf16.vlgmr.msra.gmra.mrb[0].mxu0 %v1092_v17 }
  0x6c   :  { %263 = vmatprep.mubr.bf16.mxu0 %v1254_v0  ;;  %622 = vmatpush1.bf16.msra.mxu0 %v1104_v22 }
  0x6d   :  { %623 = vmatprep.subr.bf16.mxu0 %v1109_v24 }
  0x70   :  { %624 = vmatpush1.bf16.msra.mxu0 %v1107_v25 }
  0x71   :  { %625 = vmatprep.subr.bf16.mxu0 %v1112_v26 }
  0x73   :  { %264 = vmatmul.mubr.bf16.gmra.mrb[4].mxu0 %v1093_v18 }
  0x74   :  { %273 = vmatprep.mubr.bf16.mxu0 %v1254_v0  ;;  %626 = vmatpush1.bf16.msra.mxu0 %v1110_v27 }
  0x75   :  { %627 = vmatprep.subr.bf16.mxu0 %v1115_v28 }
  0x78   :  { %628 = vmatpush1.bf16.msra.mxu0 %v1113_v29 }
  0x79   :  { %629 = vmatprep.subr.bf16.mxu0 %v1118_v30 }
  0x7b   :  { %274 = vmatmul.mubr.bf16.gmra.mrb[8].mxu0 %v1094_v19 }
  0x7c   :  { %283 = vmatprep.mubr.bf16.mxu0 %v1254_v0  ;;  %630 = vmatpush1.bf16.msra.mxu0 %v1116_v31 }
  0x7d   :  { %631 = vmatprep.subr.bf16.mxu0 %v1121_v32 }
  0x80   :  { %632 = vmatpush1.bf16.msra.mxu0 %v1119_v33 }
  0x81   :  { %633 = vmatprep.subr.bf16.mxu0 %v1124_v2 }
  0x83   :  { %284 = vmatmul.mubr.bf16.gmra.mrb[12].mxu0 %v1095_v20 }
  0x84   :  { %653 = vmatprep.mubr.bf16.mxu0 %v1254_v0  ;;  %634 = vmatpush1.bf16.msra.mxu0 %v1122_v3 }
  0x85   :  { %635 = vmatprep.subr.bf16.mxu0 %v1127_v4 }
  0x88   :  { %636 = vmatpush1.bf16.msra.mxu0 %v1125_v5 }
 0x13e   :  { %v255_v34 = vpop.f32.mrb[0].mxu0 }
 0x13f   :  { %v257_v35 = vpop.f32.mrb[1].mxu0 }
 0x140   :  { %v259_v36 = vpop.f32.mrb[2].mxu0 }
 0x141   :  { %v294_v37 = vpack.c.bf16 %v259_v36, %v255_v34  ;;  %v261_v38 = vpop.f32.mrb[3].mxu0 }
 0x142   :  { %v295_v39 = vpack.c.bf16 %v261_v38, %v257_v35 }
 0x144   :  { %978 = vmatprep.subr.bf16.mxu1 %v295_v39 }
 0x145   :  { %979 = vmatpush3.bf16.msra.mxu1 %v295_v39 }
 0x146   :  { %v265_v40 = vpop.f32.mrb[4].mxu0 }
 0x147   :  { %v267_v41 = vpop.f32.mrb[5].mxu0 }
 0x148   :  { %v269_v42 = vpop.f32.mrb[6].mxu0 }
 0x149   :  { %v296_v43 = vpack.c.bf16 %v269_v42, %v265_v40  ;;  %v271_v44 = vpop.f32.mrb[7].mxu0 }
 0x14a   :  { %v297_v45 = vpack.c.bf16 %v271_v44, %v267_v41 }
 0x14c   :  { %980 = vmatprep.subr.bf16.mxu1 %v297_v45 }
 0x14d   :  { %981 = vmatpush3.bf16.msra.mxu1 %v297_v45 }
 0x14e   :  { %v275_v46 = vpop.f32.mrb[8].mxu0 }
 0x14f   :  { %v277_v47 = vpop.f32.mrb[9].mxu0 }
 0x150   :  { %v279_v48 = vpop.f32.mrb[10].mxu0 }
 0x151   :  { %v298_v49 = vpack.c.bf16 %v279_v48, %v275_v46  ;;  %v281_v50 = vpop.f32.mrb[11].mxu0 }
 0x152   :  { %v299_v51 = vpack.c.bf16 %v281_v50, %v277_v47 }
 0x154   :  { %982 = vmatprep.subr.bf16.mxu1 %v299_v51 }
 0x155   :  { %983 = vmatpush3.bf16.msra.mxu1 %v299_v51 }
 0x156   :  { %v285_v52 = vpop.f32.mrb[12].mxu0 }
 0x157   :  { %v287_v53 = vpop.f32.mrb[13].mxu0 }
 0x158   :  { %v289_v54 = vpop.f32.mrb[14].mxu0 }
 0x159   :  { %v300_v55 = vpack.c.bf16 %v289_v54, %v285_v52  ;;  %v291_v56 = vpop.f32.mrb[15].mxu0 }
 0x15a   :  { %v301_v57 = vpack.c.bf16 %v291_v56, %v287_v53 }
 0x15c   :  { %984 = vmatprep.subr.bf16.mxu1 %v301_v57 }
 0x15d   :  { %985 = vmatpush3.bf16.msra.mxu1 %v301_v57 }
 0x15e   :  { %994 = vmatprep.subr.bf16.mxu1 %v294_v37 }
 0x160   :  { %987 = vmatmul.mubr.msk.bf16.vlgmr.msra.gmra.mrb[0].mxu1 %vm322_vm0, %v1369_v58 }
 0x161   :  { %995 = vmatpush3.bf16.msra.mxu1 %v294_v37  ;;  %990 = vmatprep.mubr.msk.bf16.mxu1 %vm322_vm0, %v1371_v59 }
 0x162   :  { %996 = vmatprep.subr.bf16.mxu1 %v296_v43 }
 0x165   :  { %997 = vmatpush3.bf16.msra.mxu1 %v296_v43 }
 0x166   :  { %998 = vmatprep.subr.bf16.mxu1 %v298_v49 }
 0x168   :  { %991 = vmatmul.mubr.msk.bf16.gmra.mrb[4].mxu1 %vm322_vm0, %v1377_v60 }
 0x169   :  { %999 = vmatpush3.bf16.msra.mxu1 %v298_v49  ;;  %1002 = vmatprep.mubr.msk.bf16.mxu1 %vm322_vm0, %v1379_v61 }
 0x16a   :  { %1000 = vmatprep.subr.bf16.mxu1 %v300_v55 }
 0x16d   :  { %1001 = vmatpush3.bf16.msra.mxu1 %v300_v55 }
 0x170   :  { %1003 = vmatmul.mubr.msk.bf16.vlgmr.msra.gmra.mrb[0].mxu1 %vm322_vm0, %v1385_v62 }
 0x171   :  { %1006 = vmatprep.mubr.msk.bf16.mxu1 %vm322_vm0, %v1387_v63 }
 0x178   :  { %1007 = vmatmul.mubr.msk.bf16.gmra.mrb[4].mxu1 %vm322_vm0, %v1393_v1 }
 0x179   :  { %1018 = vmatprep.mubr.msk.bf16.mxu1 %vm322_vm0, %v1365_v21 }
 0x243   :  { %v1004_v7 = vpop.f32.mrb[0].mxu1 }
 0x244   :  { %v506_v8 = vadd.f32 %v1004_v7, %v919_v6  ;;  %v466_v9 = vpop.f32.mrb[1].mxu1 }
 0x245   :  { %v504_v10 = vadd.f32 %v919_v6, %v466_v9  ;;  %v1005_v11 = vpop.f32.mrb[2].mxu1 }
 0x246   :  { %v507_v12 = vadd.f32 %v1005_v11, %v919_v6  ;;  %v469_v13 = vpop.f32.mrb[3].mxu1  ;;  %v514_v15 = vmax.f32 %v506_v8, 0.0 }
 0x247   :  { %v505_v14 = vadd.f32 %v919_v6, %v469_v13  ;;  %v512_v17 = vmax.f32 %v504_v10, 0.0 }
 0x248   :  { %v515_v16 = vmax.f32 %v507_v12, 0.0 }
 0x249   :  { %v513_v18 = vmax.f32 %v505_v14, 0.0 }
 0x24a   :  { %v521_v19 = vpack.c.bf16 %v515_v16, %v514_v15 }
 0x24b   :  { %v520_v20 = vpack.c.bf16 %v513_v18, %v512_v17  ;;  %v1008_v21 = vpop.f32.mrb[4].mxu1 }
 0x24c   :  { %v510_v22 = vadd.f32 %v1008_v21, %v919_v6  ;;  %v482_v23 = vpop.f32.mrb[5].mxu1 }
 0x24d   :  { %v508_v24 = vadd.f32 %v919_v6, %v482_v23  ;;  %v1009_v25 = vpop.f32.mrb[6].mxu1  ;;  %654 = vmatmul.mubr.bf16.vlgmr.msra.gmra.mrb[16].mxu0 %v520_v20 }
 0x24e   :  { %v511_v26 = vadd.f32 %v1009_v25, %v919_v6  ;;  %v485_v27 = vpop.f32.mrb[7].mxu1  ;;  %663 = vmatprep.mubr.bf16.mxu0 %v1254_v0  ;;  %v518_v29 = vmax.f32 %v510_v22, 0.0 }
 0x24f   :  { %v509_v28 = vadd.f32 %v919_v6, %v485_v27  ;;  %v516_v31 = vmax.f32 %v508_v24, 0.0 }
 0x250   :  { %v519_v30 = vmax.f32 %v511_v26, 0.0 }
 0x251   :  { %v517_v32 = vmax.f32 %v509_v28, 0.0 }
 0x252   :  { %v523_v33 = vpack.c.bf16 %v519_v30, %v518_v29 }
 0x253   :  { %v522_v34 = vpack.c.bf16 %v517_v32, %v516_v31 }
 0x255   :  { %664 = vmatmul.mubr.bf16.gmra.mrb[20].mxu0 %v521_v19 }
 0x256   :  { %673 = vmatprep.mubr.bf16.mxu0 %v1254_v0 }
 0x25d   :  { %674 = vmatmul.mubr.bf16.gmra.mrb[24].mxu0 %v522_v34 }
 0x25e   :  { %683 = vmatprep.mubr.bf16.mxu0 %v1254_v0 }
 0x265   :  { %684 = vmatmul.mubr.bf16.gmra.mrb[28].mxu0 %v523_v33 }
 0x320   :  { %v655_v35 = vpop.f32.mrb[16].mxu0 }
 0x321   :  { %v657_v36 = vpop.f32.mrb[17].mxu0 }
 0x322   :  { %v659_v37 = vpop.f32.mrb[18].mxu0 }
 0x323   :  { %v694_v38 = vpack.c.bf16 %v659_v37, %v655_v35  ;;  %v661_v39 = vpop.f32.mrb[19].mxu0 }
 0x324   :  { %v695_v40 = vpack.c.bf16 %v661_v39, %v657_v36 }
 0x326   :  { %1010 = vmatprep.subr.bf16.mxu1 %v695_v40 }
 0x327   :  { %1011 = vmatpush3.bf16.msra.mxu1 %v695_v40 }
 0x328   :  { %v665_v41 = vpop.f32.mrb[20].mxu0 }
 0x329   :  { %v667_v42 = vpop.f32.mrb[21].mxu0 }
 0x32a   :  { %v669_v43 = vpop.f32.mrb[22].mxu0 }
 0x32b   :  { %v696_v44 = vpack.c.bf16 %v669_v43, %v665_v41  ;;  %v671_v45 = vpop.f32.mrb[23].mxu0 }
 0x32c   :  { %v697_v46 = vpack.c.bf16 %v671_v45, %v667_v42 }
 0x32e   :  { %1012 = vmatprep.subr.bf16.mxu1 %v697_v46 }
 0x32f   :  { %1013 = vmatpush3.bf16.msra.mxu1 %v697_v46 }
 0x330   :  { %v675_v47 = vpop.f32.mrb[24].mxu0 }
 0x331   :  { %v677_v48 = vpop.f32.mrb[25].mxu0 }
 0x332   :  { %v679_v0 = vpop.f32.mrb[26].mxu0 }
 0x333   :  { %v698_v49 = vpack.c.bf16 %v679_v0, %v675_v47  ;;  %v681_v50 = vpop.f32.mrb[27].mxu0 }
 0x334   :  { %v699_v51 = vpack.c.bf16 %v681_v50, %v677_v48 }
 0x336   :  { %1014 = vmatprep.subr.bf16.mxu1 %v699_v51 }
 0x337   :  { %1015 = vmatpush3.bf16.msra.mxu1 %v699_v51 }
 0x338   :  { %v685_v52 = vpop.f32.mrb[28].mxu0 }
 0x339   :  { %v687_v53 = vpop.f32.mrb[29].mxu0 }
 0x33a   :  { %v689_v54 = vpop.f32.mrb[30].mxu0 }
 0x33b   :  { %v700_v55 = vpack.c.bf16 %v689_v54, %v685_v52  ;;  %v691_v56 = vpop.f32.mrb[31].mxu0 }
 0x33c   :  { %v701_v57 = vpack.c.bf16 %v691_v56, %v687_v53 }
 0x33e   :  { %1016 = vmatprep.subr.bf16.mxu1 %v701_v57 }
 0x33f   :  { %1017 = vmatpush3.bf16.msra.mxu1 %v701_v57 }
 0x340   :  { %1026 = vmatprep.subr.bf16.mxu1 %v694_v38 }
 0x342   :  { %1019 = vmatmul.mubr.msk.bf16.vlgmr.msra.gmra.mrb[8].mxu1 %vm322_vm0, %v1369_v58  ;;  %v945_v58 = vld [vmem:[%s1441_s4 + $0x1] ss:$0 sm:$0xff]  ;;  %s1255_s4 = smov [#allocation10]  }
 0x343   :  { %1027 = vmatpush3.bf16.msra.mxu1 %v694_v38  ;;  %1022 = vmatprep.mubr.msk.bf16.mxu1 %vm322_vm0, %v1371_v59  ;;  %s869_s19 = sshll.u32 %s1255_s4, 4  ;;  %s870_s19 = int_to_ptr.vmem [resolvable:$true] %s869_s19 }
 0x344   :  { %1028 = vmatprep.subr.bf16.mxu1 %v696_v44  ;;  %s1216_s20 = scalar_lea.vmem %s870_s19, 1024  ;;  %p1221_p5 = scmp.lt.s32.totalorder %s870_s19, %s870_s19 }
 0x345   :  { %p1217_p4 = scmp.ne.s32.totalorder %s870_s19, %s1216_s20  ;;  %p1222_p6 = scmp.lt.s32.totalorder %s1216_s20, %s1216_s20 }
 0x347   :  { %1029 = vmatpush3.bf16.msra.mxu1 %v696_v44  ;;  %p1223_p7 = por %p1222_p6, %p1221_p5 }
 0x348   :  { %1030 = vmatprep.subr.bf16.mxu1 %v698_v49 }
 0x349   :  { %p1224_p8 = pnand %p1223_p7, %p1217_p4 }
 0x34a   :  { %1023 = vmatmul.mubr.msk.bf16.gmra.mrb[12].mxu1 %vm322_vm0, %v1377_v60 }
 0x34b   :  { %1031 = vmatpush3.bf16.msra.mxu1 %v698_v49  ;;  %1034 = vmatprep.mubr.msk.bf16.mxu1 %vm322_vm0, %v1379_v61 }
 0x34c   :  { %1032 = vmatprep.subr.bf16.mxu1 %v700_v55 }
 0x34f   :  { %1033 = vmatpush3.bf16.msra.mxu1 %v700_v55 }
 0x352   :  { %1035 = vmatmul.mubr.msk.bf16.vlgmr.msra.gmra.mrb[8].mxu1 %vm322_vm0, %v1385_v62 }
 0x353   :  { %1038 = vmatprep.mubr.msk.bf16.mxu1 %vm322_vm0, %v1387_v63 }
 0x35a   :  { %1039 = vmatmul.mubr.msk.bf16.gmra.mrb[12].mxu1 %vm322_vm0, %v1393_v1 }
 0x425   :  { %v1036_v59 = vpop.f32.mrb[8].mxu1 }
 0x426   :  { %v842_v60 = vadd.f32 %v1036_v59, %v945_v58  ;;  %v801_v2 = vpop.f32.mrb[9].mxu1 }
 0x427   :  { %v840_v3 = vadd.f32 %v945_v58, %v801_v2  ;;  %v1037_v61 = vpop.f32.mrb[10].mxu1 }
 0x428   :  { %v850_v4 = vmax.f32 %v842_v60, 0.0  ;;  %v843_v5 = vadd.f32 %v1037_v61, %v945_v58  ;;  %v804_v6 = vpop.f32.mrb[11].mxu1 }
 0x429   :  { %v848_v7 = vmax.f32 %v840_v3, 0.0  ;;  %v841_v62 = vadd.f32 %v945_v58, %v804_v6 }
 0x42a   :  { %858 = vst [vmem:[#allocation10 + $0x10] sm:$0xff] %v850_v4  ;;  %v851_v8 = vmax.f32 %v843_v5, 0.0 }
 0x42b   :  { %856 = vst [vmem:[#allocation10] sm:$0xff] %v848_v7  ;;  %v849_v63 = vmax.f32 %v841_v62, 0.0 }
 0x42c   :  { %859 = vst [vmem:[#allocation10 + $0x18] sm:$0xff] %v851_v8 }
 0x42d   :  { %857 = vst [vmem:[#allocation10 + $0x8] sm:$0xff] %v849_v63  ;;  %v1040_v1 = vpop.f32.mrb[12].mxu1 }
 0x42e   :  { %v846_v9 = vadd.f32 %v1040_v1, %v945_v58  ;;  %v817_v10 = vpop.f32.mrb[13].mxu1 }
 0x42f   :  { %v844_v11 = vadd.f32 %v945_v58, %v817_v10  ;;  %v1041_v12 = vpop.f32.mrb[14].mxu1 }
 0x430   :  { %v854_v13 = vmax.f32 %v846_v9, 0.0  ;;  %v847_v14 = vadd.f32 %v1041_v12, %v945_v58  ;;  %v820_v15 = vpop.f32.mrb[15].mxu1 }
 0x431   :  { %v852_v16 = vmax.f32 %v844_v11, 0.0  ;;  %v845_v17 = vadd.f32 %v945_v58, %v820_v15 }
 0x432   :  { %862 = vst [vmem:[#allocation10 + $0x30] sm:$0xff] %v854_v13  ;;  %v855_v18 = vmax.f32 %v847_v14, 0.0 }
 0x433   :  { %860 = vst [vmem:[#allocation10 + $0x20] sm:$0xff] %v852_v16  ;;  %v853_v19 = vmax.f32 %v845_v17, 0.0 }
 0x434   :  { %863 = vst [vmem:[#allocation10 + $0x38] sm:$0xff] %v855_v18 }
 0x435   :  { %861 = vst [vmem:[#allocation10 + $0x28] sm:$0xff] %v853_v19 }
 0x436   :  { %1227 = shalt.err (!%p1224_p8)
}
 0x437   :  { %s1228_s24 = scalar_lea.hbm %s1442_s5, 1024 }
 0x438   :  { %p1229_p9 = scmp.ne.s32.totalorder %s1442_s5, %s1228_s24  ;;  %p1232_p10 = scmp.lt.u32.totalorder %s1228_s24, %s1442_s5 }
 0x43a   :  { %p1234_p11 = pnand %p1232_p10, %p1229_p9 }
 0x43c   :  { %1237 = shalt.err (!%p1234_p11)
}
 0x43d   :  { %875 = dma.vmem_to_hbm [thread:$0]  %s870_s19, 1024, %s1442_s5, [#allocation4], %s1252_s2, %s1252_s2, %s1253_s30  }
 0x43e   :  { %1244 = dma.done.wait [#allocation4], 1024  }
 0x43f   :  { %1245 = vsyncadd [#allocation4], 4294966272 }
 0x440   :  { %879 = vsyncpa [#allocation3], 1 }
 0x441   :  { %880 = vsyncpa [#allocation6], 1 }
 0x442   :  { %881 = vsyncpa [#allocation9], 1 }
 0x443   :  { %882 = vsyncpa [#allocation4], 1 }

</bundles_post_ra>
